<compile_context>
chip_gen: v5e
topology: v5e:2x2
jax: 0.10.0
libtpu: 0.0.40
codegen_flags: <defaults>
</compile_context>

<pallas_src>
import numpy as np
import jax
import jax.numpy as jnp
from jax.experimental import pallas as pl
from jax.experimental.pallas import tpu as pltpu


def _make_se_kernel(hw_real):
    inv_hw = 1.0 / float(hw_real)

    def kernel(x_ref, w1_ref, w2_ref, o_ref):
        # x_ref : (Nb, C, HWp) native dtype   w1_ref: (CR, C)   w2_ref: (C, CR)
        # o_ref : (Nb, C, HWp) native dtype
        # squeeze: global average pool over the spatial (lane) axis, f32 accum.
        # (padded lanes, if any, are zeros, so we divide by the real HW)
        y = jnp.sum(x_ref[...].astype(jnp.float32), axis=-1) * inv_hw      # (Nb, C)
        # excitation: fc1 -> ReLU -> fc2 -> sigmoid, contracting against the
        # weights' native (out, in) layout -- no transposes in kernel/wrapper.
        h = jax.lax.dot_general(y, w1_ref[...].astype(jnp.float32),
                                (((1,), (1,)), ((), ())),
                                preferred_element_type=jnp.float32)        # (Nb, CR)
        h = jnp.maximum(h, 0.0)
        z = jax.lax.dot_general(h, w2_ref[...].astype(jnp.float32),
                                (((1,), (1,)), ((), ())),
                                preferred_element_type=jnp.float32)        # (Nb, C)
        g = 1.0 / (1.0 + jnp.exp(-z))                                      # (Nb, C)
        # scale: re-index the ref (don't keep the whole tile live across the
        # reduction/MLP); per-channel gate broadcast over the lane-dense axis.
        o_ref[...] = (x_ref[...].astype(jnp.float32)
                      * g[:, :, None]).astype(o_ref.dtype)

    return kernel


def se_layer_forward(x_nchw, fc1_w, fc2_w):
    """SELayer forward (PyTorch semantics).

    x_nchw : (N, C, H, W)   any float dtype (bf16/f32); I/O stays in this dtype
    fc1_w  : (C//r, C)      nn.Linear(C, C//r, bias=False).weight
    fc2_w  : (C, C//r)      nn.Linear(C//r, C, bias=False).weight
    """
    N, C, H, W = x_nchw.shape
    CR = fc1_w.shape[0]
    HW = H * W
    dtype = x_nchw.dtype
    itemsize = jnp.dtype(dtype).itemsize

    # reshape only (no transpose, no dtype cast)
    x_flat = x_nchw.reshape(N, C, HW)

    # lane-dense spatial axis: pad HW up to a multiple of 128 only when needed
    # (zeros don't change the pooled sum; padding is sliced off afterwards).
    HWp = ((HW + 127) // 128) * 128
    if HWp != HW:
        x_flat = jnp.pad(x_flat, ((0, 0), (0, 0), (0, HWp - HW)))

    # --- choose samples-per-step Nb: amortize ~0.35us/step overhead while the
    # double-buffered in+out blocks stay inside a budget that also fits v7x.
    data_budget = 40 << 20                          # bytes for 2x(in) + 2x(out)
    bytes_per_sample = 4 * C * HWp * itemsize
    nb = max(1, data_budget // max(1, bytes_per_sample))
    nb = min(nb, N)
    if N >= 2:
        nb = max(1, min(nb, N // 2))                # keep >=2 grid steps (v7x 2 TCs)
    while N % nb != 0:                              # avoid partial (masked) blocks
        nb -= 1
    grid = (N // nb,)

    w_itemsize = jnp.dtype(fc1_w.dtype).itemsize
    footprint = nb * bytes_per_sample + 4 * (CR * C + C * CR) * w_itemsize
    vmem_limit = int(min(56 << 20, max(32 << 20, footprint + (8 << 20))))

    cost = pl.CostEstimate(
        flops=3 * N * C * HW + 4 * N * C * CR,
        transcendentals=N * C,
        bytes_accessed=2 * N * C * HWp * itemsize + 2 * C * CR * w_itemsize,
    )

    out_flat = pl.pallas_call(
        _make_se_kernel(HW),
        out_shape=jax.ShapeDtypeStruct((N, C, HWp), dtype),
        grid=grid,
        in_specs=[
            pl.BlockSpec((nb, C, HWp), lambda n: (n, 0, 0)),
            pl.BlockSpec((CR, C), lambda n: (0, 0)),   # weights resident across grid
            pl.BlockSpec((C, CR), lambda n: (0, 0)),
        ],
        out_specs=pl.BlockSpec((nb, C, HWp), lambda n: (n, 0, 0)),
        compiler_params=pltpu.CompilerParams(
            dimension_semantics=("parallel",),
            vmem_limit_bytes=vmem_limit,
        ),
        cost_estimate=cost,
    )(x_flat, fc1_w, fc2_w)

    if HWp != HW:
        out_flat = out_flat[..., :HW]
    return out_flat.reshape(N, C, H, W)


def ref_se_layer(x, w1, w2):
    """Numpy reference with PyTorch SELayer semantics."""
    y = x.mean(axis=(2, 3))                      # (N, C)    adaptive avg pool to 1x1
    h = np.maximum(y @ w1.T, 0.0)                # (N, C//r) Linear + ReLU
    g = 1.0 / (1.0 + np.exp(-(h @ w2.T)))        # (N, C)    Linear + Sigmoid
    return (x * g[:, :, None, None]).astype(np.float32)


if __name__ == "__main__":
    # SELayer(channel=32, reduction=16)  -> hidden = 2
    N, C, H, W = 2, 32, 16, 16
    reduction = 16
    CR = C // reduction

    key = jax.random.PRNGKey(0)
    kx, k1, k2 = jax.random.split(key, 3)
    x = jax.random.normal(kx, (N, C, H, W), jnp.float32)
    fc1_w = jax.random.normal(k1, (CR, C), jnp.float32) * 0.1
    fc2_w = jax.random.normal(k2, (C, CR), jnp.float32) * 0.1

    out = se_layer_forward(x, fc1_w, fc2_w)
    out = jax.block_until_ready(out)

    ref = ref_se_layer(np.asarray(x), np.asarray(fc1_w), np.asarray(fc2_w))
    assert out.shape == ref.shape, (out.shape, ref.shape)
    np.testing.assert_allclose(np.asarray(out), ref, rtol=1e-5, atol=1e-5)
    print("KERNEL_OK")
</pallas_src>

<mosaic_0001>
module attributes {stable_mosaic.version = 11 : i64} {
  func.func @kernel(%arg0: i32, %arg1: memref<1x32x256xf32, #tpu.memory_space<vmem>>, %arg2: memref<2x32xf32, #tpu.memory_space<vmem>>, %arg3: memref<32x2xf32, #tpu.memory_space<vmem>>, %arg4: memref<1x32x256xf32, #tpu.memory_space<vmem>>) attributes {dimension_semantics = [#tpu.dimension_semantics<parallel>], iteration_bounds = array<i64: 2>, scalar_prefetch = 0 : i64, scratch_operands = 0 : i64, tpu.core_type = #tpu.core_type<tc>, window_params = [{transform_indices = @transform_0, window_bounds = array<i64: 1, 32, 256>}, {pipeline_mode = #tpu.pipeline_mode<synchronous>, transform_indices = @transform_1, window_bounds = array<i64: 2, 32>}, {pipeline_mode = #tpu.pipeline_mode<synchronous>, transform_indices = @transform_2, window_bounds = array<i64: 32, 2>}, {transform_indices = @transform_3, window_bounds = array<i64: 1, 32, 256>}]} {
    %c0 = arith.constant 0 : index
    %c0_0 = arith.constant 0 : index
    %c0_1 = arith.constant 0 : index
    %0 = vector.load %arg1[%c0, %c0_0, %c0_1] : memref<1x32x256xf32, #tpu.memory_space<vmem>>, vector<1x32x256xf32>
    %cst = arith.constant dense<0.000000e+00> : vector<1x32xf32>
    %1 = vector.multi_reduction <add>, %0, %cst [2] : vector<1x32x256xf32> to vector<1x32xf32>
    %cst_2 = arith.constant 3.906250e-03 : f32
    %2 = vector.broadcast %cst_2 : f32 to vector<1x32xf32>
    %3 = arith.mulf %1, %2 : vector<1x32xf32>
    %c0_3 = arith.constant 0 : index
    %c0_4 = arith.constant 0 : index
    %4 = vector.load %arg2[%c0_3, %c0_4] : memref<2x32xf32, #tpu.memory_space<vmem>>, vector<2x32xf32>
    %cst_5 = arith.constant dense<0.000000e+00> : vector<1x2xf32>
    %5 = tpu.matmul %3, %4, %cst_5 {dimension_numbers = #tpu.dot_dimension_numbers<[1], [1], [0], [0], [0, 0, 1, 0], [], []>} : vector<1x32xf32>, vector<2x32xf32>, vector<1x2xf32> -> vector<1x2xf32>
    %cst_6 = arith.constant 0.000000e+00 : f32
    %6 = vector.broadcast %cst_6 : f32 to vector<1x2xf32>
    %7 = arith.maximumf %5, %6 : vector<1x2xf32>
    %c0_7 = arith.constant 0 : index
    %c0_8 = arith.constant 0 : index
    %8 = vector.load %arg3[%c0_7, %c0_8] : memref<32x2xf32, #tpu.memory_space<vmem>>, vector<32x2xf32>
    %cst_9 = arith.constant dense<0.000000e+00> : vector<1x32xf32>
    %9 = tpu.matmul %7, %8, %cst_9 {dimension_numbers = #tpu.dot_dimension_numbers<[1], [1], [0], [0], [0, 0, 1, 0], [], []>} : vector<1x2xf32>, vector<32x2xf32>, vector<1x32xf32> -> vector<1x32xf32>
    %cst_10 = arith.constant 0.000000e+00 : f32
    %10 = vector.broadcast %cst_10 : f32 to vector<1x32xf32>
    %11 = arith.subf %10, %9 : vector<1x32xf32>
    %12 = math.exp %11 : vector<1x32xf32>
    %cst_11 = arith.constant 1.000000e+00 : f32
    %13 = vector.broadcast %cst_11 : f32 to vector<1x32xf32>
    %14 = arith.addf %13, %12 : vector<1x32xf32>
    %cst_12 = arith.constant 1.000000e+00 : f32
    %15 = vector.broadcast %cst_12 : f32 to vector<1x32xf32>
    %16 = arith.divf %15, %14 : vector<1x32xf32>
    %c0_13 = arith.constant 0 : index
    %c0_14 = arith.constant 0 : index
    %c0_15 = arith.constant 0 : index
    %17 = vector.load %arg1[%c0_13, %c0_14, %c0_15] : memref<1x32x256xf32, #tpu.memory_space<vmem>>, vector<1x32x256xf32>
    %18 = vector.shape_cast %16 : vector<1x32xf32> to vector<1x32x1xf32>
    %19 = vector.broadcast %18 : vector<1x32x1xf32> to vector<1x32x256xf32>
    %20 = arith.mulf %17, %19 : vector<1x32x256xf32>
    %c0_16 = arith.constant 0 : index
    %c0_17 = arith.constant 0 : index
    %c0_18 = arith.constant 0 : index
    %21 = vector.load %arg4[%c0_16, %c0_17, %c0_18] : memref<1x32x256xf32, #tpu.memory_space<vmem>>, vector<1x32x256xf32>
    tpu.vector_store %arg4[%c0_16, %c0_17, %c0_18], %20 {strides = array<i32>} : memref<1x32x256xf32, #tpu.memory_space<vmem>>, vector<1x32x256xf32>,
    return
  }
  func.func @transform_0(%arg0: i32) -> (i32, i32, i32) {
    %c0_i32 = arith.constant 0 : i32
    %c0_i32_0 = arith.constant 0 : i32
    %c0_i32_1 = arith.constant 0 : i32
    return %arg0, %c0_i32, %c0_i32_0 : i32, i32, i32
  }
  func.func @transform_1(%arg0: i32) -> (i32, i32) {
    %c0_i32 = arith.constant 0 : i32
    %c0_i32_0 = arith.constant 0 : i32
    %c0_i32_1 = arith.constant 0 : i32
    return %c0_i32, %c0_i32_0 : i32, i32
  }
  func.func @transform_2(%arg0: i32) -> (i32, i32) {
    %c0_i32 = arith.constant 0 : i32
    %c0_i32_0 = arith.constant 0 : i32
    %c0_i32_1 = arith.constant 0 : i32
    return %c0_i32, %c0_i32_0 : i32, i32
  }
  func.func @transform_3(%arg0: i32) -> (i32, i32, i32) {
    %c0_i32 = arith.constant 0 : i32
    %c0_i32_0 = arith.constant 0 : i32
    %c0_i32_1 = arith.constant 0 : i32
    return %arg0, %c0_i32, %c0_i32_0 : i32, i32, i32
  }
}

</mosaic_0001>

<bundles_post_ra>
// kernel: tpu_custom_call.1
= control target key start
LH: loop header
LB: loop body
LE: loop exit
PB: predicated region body
PF: predicated region fallthrough
CT: control target
= control target key end

     0   :  { %8 = vsyncpa [#allocation3], 0  ;;  %s840_s0 = inlined_call_operand.hbm [shape: f32[2,32,256], index: 0, kind: input, shape index: {}]   ;;  %s841_s1 = inlined_call_operand.vmem [shape: f32[2,32], index: 1, kind: input, shape index: {}]   ;;  %s842_s2 = inlined_call_operand.vmem [shape: f32[32,2], index: 2, kind: input, shape index: {}]   ;;  %s843_s3 = inlined_call_operand.hbm [shape: f32[2,32,256], index: 3, kind: output, shape index: {}]  }
   0x1   :  { %10 = vsyncpa [#allocation3 + $0x1], 0 }
   0x2   :  { %11 = vsyncpa [#allocation4], 0 }
   0x3   :  { %13 = vsyncpa [#allocation4 + $0x1], 0  ;;  %s655_s12 = smov 0   ;;  %s657_s13 = smov 0  }
   0x4   :  { %s659_s14 = smov 0   ;;  %s661_s15 = smov 0  }
   0x5 LB: > { %s676_s16 = sadd.s32 4294967295, %s629_s15   ;;  %s451_s17 = sadd.s32 4294967294, %s629_s15   ;;  %s629_s15 = sphi %s661_s15, %s853_s15   ;;  %s625_s14 = sphi %s659_s14, %s852_s14   ;;  %s621_s13 = sphi %s657_s13, %s851_s13   ;;  %s617_s12 = sphi %s655_s12, %s850_s12  }
   0x6   : > { %s680_s18 = sadd.s32 1, %s629_s15   ;;  %s26_s19 = sadd.s32 1, %s625_s14 }
   0x7   : > { %s23_s20 = ssub.s32 %s629_s15, %s680_s18  ;;  %p33_p0 = scmp.ne.s32.totalorder %s625_s14, %s621_s13 }
   0x8   : > { %p24_p1 = scmp.eq.s32.totalorder %s23_s20, 0  ;;  %p34_p2 = scmp.eq.s32.totalorder %s629_s15, 0 }
   0x9   : > { %p39_p3 = scmp.ne.s32.totalorder %s621_s13, %s617_s12  ;;  %p40_p4 = scmp.eq.s32.totalorder %s676_s16, 0 }
   0xa   : > { %s692_s21 = scalar_select %p24_p1, %s625_s14, %s26_s19  }
   0xb   : > { %p694_p5 = por %p34_p2, %p33_p0  ;;  %p698_p6 = por %p40_p4, %p39_p3 }
   0xc   : > { %p105_p7 = scmp.eq.s32.totalorder %s676_s16, 1  ;;  %p111_p8 = scmp.eq.s32.totalorder %s451_s17, 1 }
   0xd   : > { %p486_p10 = scmp.lt.s32.totalorder %s629_s15, 2  ;;  %s137_s26 = sand.u32 1, %s625_s14  }
   0xe   : > { %p705_p11 = por %p105_p7, %p33_p0  ;;  %p709_p12 = por %p111_p8, %p39_p3 }
   0xf   : > { %s472_s27 = sshll.u32 %s629_s15, 6  ;;  %s454_s28 = sshll.u32 %s137_s26, 6 }
  0x10   : > { %s146_s4 = scalar_lea.hbm %s840_s0, %s472_s27  ;;  %s141_s6 = scalar_lea.vmem [#allocation2], %s454_s28 }
  0x11   : > { %s147_s5 = sshll.u32 %s146_s4, 4  ;;  %s149_s7 = sshll.u32 %s141_s6, 4  ;;  %s148_s5 = int_to_ptr.hbm [resolvable:$true] %s147_s5  ;;  %s150_s7 = int_to_ptr.vmem [resolvable:$true] %s149_s7 }
  0x12   : > { %p720_p13 = pnand %p486_p10, %p694_p5  ;;  %p457_p0 = scmp.ge.s32.totalorder %s629_s15, 1 }
  0x13   : > { %p157_p1 = scmp.lt.s32.totalorder %s629_s15, 3  ;;  %s138_s9 = scalar_lea.sflag [#allocation3], %s137_s26 }
  0x14   : > { %s533_s10 = sshra.s32 %s148_s5, 4  ;;  %p537_p3 = pneg %p720_p13  ;;  %s534_s10 = int_to_ptr.hbm [resolvable:$true] %s533_s10 }
  0x15   : > { %s535_s11 = scalar_lea.hbm %s534_s10, 64  ;;  %s540_s20 = scalar_lea.hbm %s840_s0, 128 }
  0x16   : > { %p536_p2 = scmp.ne.s32.totalorder %s534_s10, %s535_s11  ;;  %p541_p5 = scmp.lt.s32.totalorder %s534_s10, %s840_s0 }
  0x17   : > { %p542_p8 = scmp.lt.s32.totalorder %s540_s20, %s535_s11 }
  0x18   : > { %p538_p4 = pnand %p537_p3, %p536_p2 }
  0x19   : > { %p543_p10 = por %p542_p8, %p541_p5 }
  0x1a   : > { %p539_p7 = pneg %p538_p4 }
  0x1c   : > { %p544_p9 = pnand %p543_p10, %p539_p7 }
  0x1e   : > { %547 = shalt.err (!%p544_p9)
}
  0x1f   : > { %s631_s26 = smov 256   ;;  %s632_s28 = smov 16  }
  0x20   : > { %481 = dma.hbm_to_vmem [thread:$0]  (!%p720_p13), %s148_s5, 1024, %s150_s7, %s138_s9, %s631_s26, %s631_s26, %s632_s28  }
  0x21   : > { %p158_p2 = pnand %p457_p0, %p157_p1 }
  0x22   : > { %s741_s29 = sand.u32 (!%p158_p2), 1, %s621_s13  }
  0x23   : > { %161 = sbr.rel (%p158_p2) target bundleno = 585 (0x249), region = 32  ;;  %s458_s30 = sshll.u32 (!%p158_p2), %s741_s29, 6 }
  0x24   : > { %s164_s4 = scalar_lea.sflag (!%p158_p2), [#allocation3], %s741_s29  ;;  %s167_s6 = scalar_lea.vmem (!%p158_p2), [#allocation2], %s458_s30 }
  0x28   : > { %608 = dma.done.wait (%p698_p6), %s164_s4, 1024  }
  0x29   : > { %610 = vsyncadd (%p698_p6), %s164_s4, 4294966272  ;;  %v751_v0 = vld [vmem:[%s167_s6] sm:$0xff]  ;;  %v753_v1 = vld [vmem:[%s167_s6 + $0x8] sm:$0xff]  ;;  %vm235_vm0 = vcmask 261120   ;;  %vm266_vm1 = vcmask 15360   ;;  %v220_v16 = vlaneseq  ;;  %vm225_vm2 = vcmask 130112  }
  0x2a   : > { %v755_v2 = vld [vmem:[%s167_s6 + $0x20] sm:$0xff]  ;;  %v199_v3 = vadd.f32 %v753_v1, %v751_v0  ;;  %v759_v4 = vld [vmem:[%s167_s6 + $0x28] sm:$0xff]  ;;  %v763_v6 = vld [vmem:[%s167_s6 + $0x10] sm:$0xff]  ;;  %vm229_vm3 = vcmask 195712   ;;  %vm233_vm4 = vcmask 261312   ;;  %s190_s22 = scalar_lea.vmem [#allocation5], %s458_s30 }
  0x2b   : > { %v205_v5 = vadd.f32 %v759_v4, %v755_v2  ;;  %v765_v7 = vld [vmem:[%s167_s6 + $0x18] sm:$0xff]  ;;  %v767_v8 = vld [vmem:[%s167_s6 + $0x30] sm:$0xff]  ;;  %v215_v12 = vld [vmem:[%s841_s1] sm:$0x3]  ;;  %v221_v19 = vand.u32 127, %v220_v16  ;;  %v323_v39 = vshrl.u32 %v220_v16, 7 }
  0x2c   : > { %200 = vadd.xlane.f32.xlu0 %v199_v3  ;;  %v769_v9 = vld [vmem:[%s167_s6 + $0x38] sm:$0xff]  ;;  %v202_v10 = vadd.f32 %v765_v7, %v763_v6  ;;  %460 = vmatpush.xpose.msk.msra.mxu0 %vm235_vm0, %v215_v12  ;;  %v264_v14 = vld [vmem:[%s842_s2 + $0x10] sm:$0xff]  ;;  %v263_v15 = vld [vmem:[%s842_s2 + $0x8] sm:$0xff]  ;;  %s473_s27 = sshll.u32 %s676_s16, 6  ;;  %s375_s6 = sshll.u32 %s190_s22, 4  ;;  %s376_s6 = int_to_ptr.vmem [resolvable:$true] %s375_s6 }
  0x2d   : > { %206 = vadd.xlane.f32.xlu1 %v205_v5  ;;  %v208_v11 = vadd.f32 %v769_v9, %v767_v8  ;;  %v265_v13 = vld [vmem:[%s842_s2 + $0x18] sm:$0xff]  ;;  %v223_v21 = vadd.s32 4294967288, %v221_v19  ;;  %v227_v22 = vadd.s32 4294967280, %v221_v19  ;;  %v231_v25 = vadd.s32 4294967272, %v221_v19  ;;  %v262_v36 = vld [vmem:[%s842_s2] sm:$0xff]  ;;  %524 = vset.pattern.permute.xlu2 %v323_v39  ;;  %s374_s4 = scalar_lea.hbm %s843_s3, %s473_s27  ;;  %s363_s16 = scalar_lea.sflag [#allocation4], %s741_s29 }
  0x2e   : > { %462 = vmatpush.xpose.msk.msra.mxu1 %vm266_vm1, %v265_v13  ;;  %v342_v40 = vadd.s32 24, %v323_v39  ;;  %v336_v41 = vadd.s32 16, %v323_v39  ;;  %v330_v58 = vadd.s32 8, %v323_v39  ;;  %s377_s23 = sshll.u32 %s374_s4, 4  ;;  %s583_s9 = scalar_lea.hbm %s843_s3, 128  ;;  %s378_s23 = int_to_ptr.hbm [resolvable:$true] %s377_s23 }
  0x2f   : > { %s577_s30 = sshra.s32 %s378_s23, 4  ;;  %s578_s30 = int_to_ptr.hbm [resolvable:$true] %s577_s30 }
  0x30   : > { %527 = vset.pattern.permute.xlu1 %v342_v40  ;;  %526 = vset.pattern.permute.xlu0 %v336_v41  ;;  %s579_s5 = scalar_lea.hbm %s578_s30, 64  ;;  %p584_p0 = scmp.lt.s32.totalorder %s578_s30, %s843_s3 }
  0x31   : > { %p580_p6 = scmp.ne.s32.totalorder %s578_s30, %s579_s5  ;;  %p585_p1 = scmp.lt.s32.totalorder %s583_s9, %s579_s5 }
  0x32   : > { %463 = vmatpush.xpose.msk.msra.mxu1 %vm266_vm1, %v264_v14 }
  0x33   : > { %p581_p9 = pnand %p580_p6, %p705_p11  ;;  %p586_p3 = por %p585_p1, %p584_p0 }
  0x34   : > { %203 = vadd.xlane.f32.xlu0 %v202_v10 }
  0x35   : > { %209 = vadd.xlane.f32.xlu1 %v208_v11  ;;  %p582_p13 = pneg %p581_p9 }
  0x36   : > { %464 = vmatpush.xpose.msk.msra.mxu1 %vm266_vm1, %v263_v15 }
  0x37   : > { %p587_p4 = pnand %p586_p3, %p582_p13 }
  0x3a   : > { %465 = vmatpush.xpose.msk.msra.mxu1 %vm266_vm1, %v262_v36 }
  0x9f   : > { %v201_v17 = vpop.xlane.xlu0 %200 }
  0xa0   : > { %v207_v18 = vpop.xlane.xlu1 %206  ;;  %v211_v20 = vmul.f32 0.00390625, %v201_v17 }
  0xa1   : > { %v213_v23 = vmul.f32 0.00390625, %v207_v18 }
  0xa2   : > { %v222_v29 = vperm.slane %v211_v20, %v221_v19 }
  0xa3   : > { %v228_v31 = vperm.slane %v213_v23, %v227_v22 }
  0xa7   : > { %v204_v24 = vpop.xlane.xlu0 %203 }
  0xa8   : > { %v212_v26 = vmul.f32 0.00390625, %v204_v24  ;;  %v210_v27 = vpop.xlane.xlu1 %209 }
  0xa9   : > { %v214_v28 = vmul.f32 0.00390625, %v210_v27 }
  0xaa   : > { %v224_v30 = vperm.slane %v212_v26, %v223_v21 }
  0xab   : > { %v232_v32 = vperm.slane %v214_v28, %v231_v25 }
  0xac   : > { %v226_v33 = vsel %vm225_vm2, %v224_v30, %v222_v29 }
  0xad   : > { %v230_v34 = vsel %vm229_vm3, %v228_v31, %v226_v33 }
  0xae   : > { %v234_v35 = vsel %vm233_vm4, %v232_v32, %v230_v34 }
  0xaf   : > { %461 = vmatmul.msk.f32.vlgmr.msra.gmra.mxu0 %vm235_vm0, %v234_v35 }
 0x12c   : > { %v258_v37 = vpop.f32.mrf.mxu0 }
 0x12d   : > { %v261_v38 = vmax.f32 %v258_v37, 0.0 }
 0x12f   : > { %466 = vmatmul.msk.f32.vlgmr.msra.gmra.mxu1 %vm266_vm1, %v261_v38 }
 0x1ac   : > { %v299_v42 = vpop.f32.mrf.mxu1 }
 0x1ad   : > { %v302_v43 = vsub.f32 0.0, %v299_v42 }
 0x1af   : > { %v303_v44 = vmul.f32 1.442695, %v302_v43 }
 0x1b1   : > { %529 = vpow2.f32 %v303_v44 }
 0x1b7   : > { %v530_v45 = vpop.eup %529 }
 0x1b8   : > { %v305_v46 = vadd.f32 1.0, %v530_v45 }
 0x1ba   : > { %531 = vrcp.f32 %v305_v46  ;;  %v317_v50 = vand.u32 2147483648, %v305_v46  ;;  %v315_v52 = vand.u32 2147483647, %v305_v46  ;;  %vm311_vm6 = vweird.f32 %v305_v46 }
 0x1bc   : > { %v318_v54 = vor.u32 1.1754944e-38, %v317_v50  ;;  %vm316_vm8 = vcmp.eq.f32.partialorder %v315_v52, 8.507059e+37 }
 0x1c0   : > { %v532_v47 = vpop.eup %531 }
 0x1c1   : > { %v307_v48 = vmul.f32 %v532_v47, %v305_v46  ;;  %vm312_vm5 = vweird.f32 %v532_v47 }
 0x1c2   : > { %vm313_vm7 = vmor %vm311_vm6, %vm312_vm5 }
 0x1c3   : > { %v308_v49 = vsub.f32 1.0, %v307_v48 }
 0x1c5   : > { %v309_v51 = vmul.f32 %v532_v47, %v308_v49 }
 0x1c7   : > { %v310_v53 = vadd.f32 %v532_v47, %v309_v51 }
 0x1c9   : > { %v314_v55 = vsel %vm313_vm7, %v532_v47, %v310_v53 }
 0x1ca   : > { %v319_v56 = vsel %vm316_vm8, %v318_v54, %v314_v55 }
 0x1cb   : > { %v321_v57 = vperm.slane %v319_v56, 0 }
 0x1cd   : > { %344 = vperm.xlu1 %527, %v321_v57   ;;  %338 = vperm.xlu0 %526, %v321_v57  }
 0x1ce   : > { %326 = vperm.xlu2 %524, %v321_v57  }
 0x1d5   : > { %528 = vset.pattern.permute.xlu0 %v342_v40 }
 0x1d6   : > { %525 = vset.pattern.permute.xlu2 %v330_v58 }
 0x1de   : > { %332 = vperm.xlu2 %525, %v321_v57  }
 0x228   : > { %v327_v59 = vpop.permute.xlu2 %326 }
 0x229   : > { %v346_v60 = vmul.f32 %v327_v59, %v751_v0  ;;  %v347_v61 = vmul.f32 %v327_v59, %v753_v1 }
 0x22b   : > { %354 = vst [vmem:[%s190_s22] sm:$0xff] %v346_v60 }
 0x22c   : > { %355 = vst [vmem:[%s190_s22 + $0x8] sm:$0xff] %v347_v61 }
 0x238   : > { %v333_v62 = vpop.permute.xlu2 %332 }
 0x239   : > { %v348_v63 = vmul.f32 %v333_v62, %v763_v6  ;;  %v349_v3 = vmul.f32 %v333_v62, %v765_v7 }
 0x23b   : > { %356 = vst [vmem:[%s190_s22 + $0x10] sm:$0xff] %v348_v63 }
 0x23c   : > { %357 = vst [vmem:[%s190_s22 + $0x18] sm:$0xff] %v349_v3 }
 0x23f   : > { %v345_v0 = vpop.permute.xlu1 %344  ;;  %v339_v1 = vpop.permute.xlu0 %338 }
 0x240   : > { %v352_v5 = vmul.f32 %v345_v0, %v767_v8  ;;  %v353_v10 = vmul.f32 %v345_v0, %v769_v9  ;;  %v350_v6 = vmul.f32 %v339_v1, %v755_v2  ;;  %v351_v7 = vmul.f32 %v339_v1, %v759_v4 }
 0x242   : > { %360 = vst [vmem:[%s190_s22 + $0x30] sm:$0xff] %v352_v5 }
 0x243   : > { %361 = vst [vmem:[%s190_s22 + $0x38] sm:$0xff] %v353_v10 }
 0x244   : > { %358 = vst [vmem:[%s190_s22 + $0x20] sm:$0xff] %v350_v6 }
 0x245   : > { %359 = vst [vmem:[%s190_s22 + $0x28] sm:$0xff] %v351_v7 }
 0x246   : > { %590 = shalt.err (!%p587_p4)
}
 0x247   : > { %s633_s29 = smov 256   ;;  %s634_s17 = smov 16  }
 0x248   : > { %476 = dma.vmem_to_hbm [thread:$0]  (%p705_p11), %s376_s6, 1024, %s378_s23, %s363_s16, %s633_s29, %s633_s29, %s634_s17  }
 0x249 PF: > { %s392_s19 = sand.u32 1, %s617_s12   ;;  %p849_p7 = scmp.ge.s32.totalorder %s629_s15, 2 }
 0x24a   : > { %s393_s20 = scalar_lea.sflag [#allocation4], %s392_s19 }
 0x24b   : > { %p483_p5 = pnand %p849_p7, %p709_p12 }
 0x24d   : > { %p484_p8 = pneg %p483_p5 }
 0x24f   : > { %612 = dma.done.wait (%p484_p8), %s393_s20, 1024  }
 0x250   : > { %614 = vsyncadd (%p484_p8), %s393_s20, 4294966272  ;;  %p16_p10 = scmp.ge.s32.totalorder %s680_s18, 4   ;;  %s850_s12 = smov %s621_s13 }
 0x251   : > { %s851_s13 = smov %s625_s14  ;;  %s852_s14 = smov %s692_s21 }
 0x252   : > { %s853_s15 = smov %s680_s18  ;;  %18 = sbr.rel (!%p16_p10) target bundleno = 5 (0x5), region = 77 }
 0x257   :  { %399 = vsyncpa [#allocation3], 1 }
 0x258   :  { %401 = vsyncpa [#allocation3 + $0x1], 1 }
 0x259   :  { %402 = vsyncpa [#allocation4], 1 }
 0x25a   :  { %404 = vsyncpa [#allocation4 + $0x1], 1 }

</bundles_post_ra>
